<compile_context>
chip_gen: v6e
topology: v6e:2x2x1
jax: 0.10.0
libtpu: 0.0.40
codegen_flags: <defaults>
</compile_context>

<pallas_src>
import math

import jax
import jax.numpy as jnp
from jax import lax
from jax.experimental import pallas as pl
from jax.experimental.pallas import tpu as pltpu

BATCH = 2
SEQ = 8
HIDDEN = 32
NUM_HEADS = 4
HEAD_SIZE = HIDDEN // NUM_HEADS
M_TOKENS = BATCH * SEQ              # 16 flattened (batch, seq) tokens
NM = NUM_HEADS * M_TOKENS           # 64 packed (head, token) rows
NEG_INF = -1000000.0                # matches the module's masked value (-1e6)


def mha_kernel(xt_ref, wqkvt_ref, wo_ref, bo_ref, bias_ref, o_ref):
    """Whole-problem multi-head masked attention (packed-head formulation).

    xt_ref    : (H+1, M)     activations transposed (feature, token) + ones row
    wqkvt_ref : (3H, H+1)    W_QKV^T rows ordered (q/k/v, head, head_dim);
                             Q rows pre-scaled by 1/sqrt(head_size);
                             last column is the (pre-scaled) bias b_QKV
    wo_ref    : (NH, HS, H)  W_O reshaped head-major
    bo_ref    : (1, H)
    bias_ref  : (NM, NM)     additive bias over packed (head, token) rows/cols:
                             0 where same head & same batch & causal, NEG_INF else
    o_ref     : (M, H)
    """
    # --- fused QKV projection (+bias via the ones row): one MXU matmul ---
    qkv = jnp.dot(wqkvt_ref[...], xt_ref[...],
                  preferred_element_type=jnp.float32)            # (3H, M)
    qkv = qkv.reshape(3, NUM_HEADS, HEAD_SIZE, M_TOKENS)

    # pack heads into the matmul M dimension: (NH, M, HS) -> (NH*M, HS)
    q = jnp.swapaxes(qkv[0], 1, 2).reshape(NM, HEAD_SIZE)        # (64, 8)
    k = jnp.swapaxes(qkv[1], 1, 2).reshape(NM, HEAD_SIZE)
    v = jnp.swapaxes(qkv[2], 1, 2).reshape(NM, HEAD_SIZE)

    # --- scores for all heads / both batches in ONE 2D matmul (q @ k^T) ---
    s = lax.dot_general(q, k, (((1,), (1,)), ((), ())),
                        preferred_element_type=jnp.float32)       # (64, 64)
    s = s + bias_ref[...]                                         # block-diag mask

    # --- single fused softmax over keys (one max / exp / sum / reciprocal) ---
    s_max = jnp.max(s, axis=-1, keepdims=True)
    e = jnp.exp(s - s_max)                                        # EUP
    denom = jnp.sum(e, axis=-1, keepdims=True)
    p = e * pl.reciprocal(denom, approx=True)                     # EUP + VPU mul

    # --- attention values: ONE 2D matmul over the packed rows ---
    av = jnp.dot(p, v, preferred_element_type=jnp.float32)        # (64, 8)

    # --- output projection (batched over heads) + head-sum + bias ---
    av3 = av.reshape(NUM_HEADS, M_TOKENS, HEAD_SIZE)
    outh = jnp.einsum("nqd,ndj->nqj", av3, wo_ref[...],
                      preferred_element_type=jnp.float32)         # (NH, M, H)
    out = jnp.sum(outh, axis=0) + bo_ref[...]                     # (M, H)

    o_ref[...] = out.astype(o_ref.dtype)

    # TODO(synk): dropout1 (on probs) / dropout2 (on values) are identity here
    # (eval semantics); training-mode stochastic dropout is not reproduced.


def prepare_params(params):
    """One-time (hoisted) preprocessing of weights / mask into kernel layout."""
    w_qkv, b_qkv, w_o, b_o = params
    H = HIDDEN

    scale = 1.0 / math.sqrt(HEAD_SIZE)
    row_scale = jnp.concatenate(
        [jnp.full((H,), scale, jnp.float32), jnp.ones((2 * H,), jnp.float32)])
    wqkv_t = w_qkv.T.astype(jnp.float32) * row_scale[:, None]      # (3H, H)
    bqkv_c = (b_qkv.astype(jnp.float32) * row_scale)[:, None]      # (3H, 1)
    wqkv_aug = jnp.concatenate([wqkv_t, bqkv_c], axis=1)           # (3H, H+1)

    wo3 = w_o.astype(jnp.float32).reshape(NUM_HEADS, HEAD_SIZE, H) # head-major
    bo_row = b_o.astype(jnp.float32).reshape(1, H)

    # (64, 64) additive bias over packed (head, batch, pos) rows/cols:
    # row r = head*M + batch*S + q_pos attends to col c iff same head, same
    # batch element, and k_pos <= q_pos.  Everything else gets NEG_INF.
    idx = jnp.arange(NM)
    head = idx // M_TOKENS
    bat = (idx % M_TOKENS) // SEQ
    pos = idx % SEQ
    allowed = ((head[:, None] == head[None, :])
               & (bat[:, None] == bat[None, :])
               & (pos[:, None] >= pos[None, :]))
    attn_bias = jnp.where(allowed, 0.0, NEG_INF).astype(jnp.float32)

    return wqkv_aug, wo3, bo_row, attn_bias


@jax.jit
def mha_forward(x, kernel_params):
    """x: (B, S, H).  kernel_params = prepare_params(raw_params) (cached)."""
    wqkv_aug, wo3, bo_row, attn_bias = kernel_params
    B, S, H = x.shape
    M = B * S

    # only x-dependent prep stays in the per-call path
    xt_aug = jnp.concatenate(
        [x.reshape(M, H).T.astype(jnp.float32), jnp.ones((1, M), jnp.float32)],
        axis=0)                                                    # (H+1, M)

    flops = (2 * 3 * H * (H + 1) * M            # QKV projection
             + 2 * NM * HEAD_SIZE * NM          # scores
             + 2 * NM * NM * HEAD_SIZE          # AV
             + 2 * NUM_HEADS * M * HEAD_SIZE * H)   # output projection
    cost = pl.CostEstimate(
        flops=flops,
        transcendentals=NM * NM + NM,           # exp + reciprocal
        bytes_accessed=4 * ((H + 1) * M + 3 * H * (H + 1) + H * H + H
                            + NM * NM + M * H))

    vmem = pl.BlockSpec(memory_space=pltpu.MemorySpace.VMEM)
    out2d = pl.pallas_call(
        mha_kernel,
        out_shape=jax.ShapeDtypeStruct((M, H), x.dtype),
        in_specs=[vmem] * 5,
        out_specs=vmem,
        cost_estimate=cost,
    )(xt_aug, wqkv_aug, wo3, bo_row, attn_bias)
    return out2d.reshape(B, S, H)


# ---------------- pure-JAX reference (mirrors the PyTorch module) ----------------
def mha_ref(x, params):
    w_qkv, b_qkv, w_o, b_o = params
    B, S, H = x.shape
    qkv = x @ w_qkv + b_qkv
    q, k, v = jnp.split(qkv, 3, axis=-1)
    q = q.reshape(B, S, NUM_HEADS, HEAD_SIZE)
    k = k.reshape(B, S, NUM_HEADS, HEAD_SIZE)
    v = v.reshape(B, S, NUM_HEADS, HEAD_SIZE)
    scores = jnp.einsum("bqnh,bknh->bnqk", q, k) / math.sqrt(HEAD_SIZE)
    mask = jnp.arange(S)[:, None] >= jnp.arange(S)[None, :]
    scores = jnp.where(mask, scores, NEG_INF)
    probs = jax.nn.softmax(scores, axis=-1)
    av = jnp.einsum("bnqk,bknh->bqnh", probs, v).reshape(B, S, H)
    return av @ w_o + b_o


if __name__ == "__main__":
    key = jax.random.PRNGKey(0)
    kx, k1, k2, k3, k4 = jax.random.split(key, 5)
    x = jax.random.normal(kx, (BATCH, SEQ, HIDDEN), jnp.float32)
    params = (
        0.02 * jax.random.normal(k1, (HIDDEN, 3 * HIDDEN), jnp.float32),
        0.02 * jax.random.normal(k2, (3 * HIDDEN,), jnp.float32),
        0.02 * jax.random.normal(k3, (HIDDEN, HIDDEN), jnp.float32),
        0.02 * jax.random.normal(k4, (HIDDEN,), jnp.float32),
    )

    # one-time layout prep (hoisted out of the per-call jitted path)
    kernel_params = jax.tree_util.tree_map(jax.block_until_ready,
                                           prepare_params(params))

    out = jax.block_until_ready(mha_forward(x, kernel_params))
    ref = mha_ref(x, params)
    assert out.shape == (BATCH, SEQ, HIDDEN)
    max_err = float(jnp.max(jnp.abs(out - ref)))
    assert jnp.allclose(out, ref, atol=1e-4, rtol=1e-3), max_err
    print("KERNEL_OK")
</pallas_src>

<mosaic_0001>
module attributes {stable_mosaic.version = 11 : i64} {
  func.func @mha_kernel(%arg0: memref<33x16xf32, #tpu.memory_space<vmem>>, %arg1: memref<96x33xf32, #tpu.memory_space<vmem>>, %arg2: memref<4x8x32xf32, #tpu.memory_space<vmem>>, %arg3: memref<1x32xf32, #tpu.memory_space<vmem>>, %arg4: memref<64x64xf32, #tpu.memory_space<vmem>>, %arg5: memref<16x32xf32, #tpu.memory_space<vmem>>) attributes {dimension_semantics = [], scalar_prefetch = 0 : i64, scratch_operands = 0 : i64, tpu.core_type = #tpu.core_type<tc>} {
    %c0 = arith.constant 0 : index
    %c0_0 = arith.constant 0 : index
    %0 = vector.load %arg1[%c0, %c0_0] : memref<96x33xf32, #tpu.memory_space<vmem>>, vector<96x33xf32>
    %c0_1 = arith.constant 0 : index
    %c0_2 = arith.constant 0 : index
    %1 = vector.load %arg0[%c0_1, %c0_2] : memref<33x16xf32, #tpu.memory_space<vmem>>, vector<33x16xf32>
    %cst = arith.constant dense<0.000000e+00> : vector<96x16xf32>
    %2 = tpu.matmul %0, %1, %cst {dimension_numbers = #tpu.dot_dimension_numbers<[1], [0], [0], [1], [0, 0, 1, 1], [], []>} : vector<96x33xf32>, vector<33x16xf32>, vector<96x16xf32> -> vector<96x16xf32>
    %3 = vector.shape_cast %2 : vector<96x16xf32> to vector<3x4x8x16xf32>
    %4 = vector.extract_strided_slice %3 {offsets = [0, 0, 0, 0], sizes = [1, 4, 8, 16], strides = [1, 1, 1, 1]} : vector<3x4x8x16xf32> to vector<1x4x8x16xf32>
    %5 = vector.shape_cast %4 : vector<1x4x8x16xf32> to vector<4x8x16xf32>
    %6 = tpu.transpose %5, [0, 2, 1] : vector<4x8x16xf32> -> vector<4x16x8xf32>
    %7 = vector.shape_cast %6 : vector<4x16x8xf32> to vector<64x8xf32>
    %8 = vector.extract_strided_slice %3 {offsets = [1, 0, 0, 0], sizes = [1, 4, 8, 16], strides = [1, 1, 1, 1]} : vector<3x4x8x16xf32> to vector<1x4x8x16xf32>
    %9 = vector.shape_cast %8 : vector<1x4x8x16xf32> to vector<4x8x16xf32>
    %10 = tpu.transpose %9, [0, 2, 1] : vector<4x8x16xf32> -> vector<4x16x8xf32>
    %11 = vector.shape_cast %10 : vector<4x16x8xf32> to vector<64x8xf32>
    %12 = vector.extract_strided_slice %3 {offsets = [2, 0, 0, 0], sizes = [1, 4, 8, 16], strides = [1, 1, 1, 1]} : vector<3x4x8x16xf32> to vector<1x4x8x16xf32>
    %13 = vector.shape_cast %12 : vector<1x4x8x16xf32> to vector<4x8x16xf32>
    %14 = tpu.transpose %13, [0, 2, 1] : vector<4x8x16xf32> -> vector<4x16x8xf32>
    %15 = vector.shape_cast %14 : vector<4x16x8xf32> to vector<64x8xf32>
    %cst_3 = arith.constant dense<0.000000e+00> : vector<64x64xf32>
    %16 = tpu.matmul %7, %11, %cst_3 {dimension_numbers = #tpu.dot_dimension_numbers<[1], [1], [0], [0], [0, 0, 1, 0], [], []>} : vector<64x8xf32>, vector<64x8xf32>, vector<64x64xf32> -> vector<64x64xf32>
    %c0_4 = arith.constant 0 : index
    %c0_5 = arith.constant 0 : index
    %17 = vector.load %arg4[%c0_4, %c0_5] : memref<64x64xf32, #tpu.memory_space<vmem>>, vector<64x64xf32>
    %18 = arith.addf %16, %17 : vector<64x64xf32>
    %cst_6 = arith.constant dense<0xFF800000> : vector<64xf32>
    %19 = vector.multi_reduction <maximumf>, %18, %cst_6 [1] : vector<64x64xf32> to vector<64xf32>
    %20 = vector.shape_cast %19 : vector<64xf32> to vector<64x1xf32>
    %21 = vector.broadcast %20 : vector<64x1xf32> to vector<64x64xf32>
    %22 = arith.subf %18, %21 : vector<64x64xf32>
    %23 = math.exp %22 : vector<64x64xf32>
    %cst_7 = arith.constant dense<0.000000e+00> : vector<64xf32>
    %24 = vector.multi_reduction <add>, %23, %cst_7 [1] : vector<64x64xf32> to vector<64xf32>
    %25 = vector.shape_cast %24 : vector<64xf32> to vector<64x1xf32>
    %26 = tpu.reciprocal %25 {approx = true} : vector<64x1xf32> -> vector<64x1xf32>
    %27 = vector.broadcast %26 : vector<64x1xf32> to vector<64x64xf32>
    %28 = arith.mulf %23, %27 : vector<64x64xf32>
    %cst_8 = arith.constant dense<0.000000e+00> : vector<64x8xf32>
    %29 = tpu.matmul %28, %15, %cst_8 {dimension_numbers = #tpu.dot_dimension_numbers<[1], [0], [0], [1], [0, 0, 1, 1], [], []>} : vector<64x64xf32>, vector<64x8xf32>, vector<64x8xf32> -> vector<64x8xf32>
    %30 = vector.shape_cast %29 : vector<64x8xf32> to vector<4x16x8xf32>
    %c0_9 = arith.constant 0 : index
    %c0_10 = arith.constant 0 : index
    %c0_11 = arith.constant 0 : index
    %31 = vector.load %arg2[%c0_9, %c0_10, %c0_11] : memref<4x8x32xf32, #tpu.memory_space<vmem>>, vector<4x8x32xf32>
    "tpu.trace_start"() <{level = 10 : i32, message = "nqd,ndj->nqj"}> : () -> ()
    %cst_12 = arith.constant dense<0.000000e+00> : vector<4x16x32xf32>
    %32 = tpu.matmul %30, %31, %cst_12 {dimension_numbers = #tpu.dot_dimension_numbers<[2], [1], [1], [2], [0, 0, 0, 1, 1, 2], [0], [0]>} : vector<4x16x8xf32>, vector<4x8x32xf32>, vector<4x16x32xf32> -> vector<4x16x32xf32>
    "tpu.trace_stop"() : () -> ()
    %cst_13 = arith.constant dense<0.000000e+00> : vector<16x32xf32>
    %33 = vector.multi_reduction <add>, %32, %cst_13 [0] : vector<4x16x32xf32> to vector<16x32xf32>
    %c0_14 = arith.constant 0 : index
    %c0_15 = arith.constant 0 : index
    %34 = vector.load %arg3[%c0_14, %c0_15] : memref<1x32xf32, #tpu.memory_space<vmem>>, vector<1x32xf32>
    %35 = vector.broadcast %34 : vector<1x32xf32> to vector<16x32xf32>
    %36 = arith.addf %33, %35 : vector<16x32xf32>
    %c0_16 = arith.constant 0 : index
    %c0_17 = arith.constant 0 : index
    %37 = vector.load %arg5[%c0_16, %c0_17] : memref<16x32xf32, #tpu.memory_space<vmem>>, vector<16x32xf32>
    tpu.vector_store %arg5[%c0_16, %c0_17], %36 {strides = array<i32>} : memref<16x32xf32, #tpu.memory_space<vmem>>, vector<16x32xf32>,
    return
  }
}

</mosaic_0001>

<bundles_post_ra>
// kernel: mha_forward.1
= control target key start
LH: loop header
LB: loop body
LE: loop exit
PB: predicated region body
PF: predicated region fallthrough
CT: control target
= control target key end

     0   :  { %vm75_vm0 = vcmask 1040384   ;;  %vm38_vm1 = vcmask 269312   ;;  %s1837_s0 = inlined_call_operand.vmem [shape: f32[33,16], index: 0, kind: input, shape index: {}]   ;;  %s1838_s1 = inlined_call_operand.vmem [shape: f32[96,33], index: 1, kind: input, shape index: {}]   ;;  %s1839_s2 = inlined_call_operand.vmem [shape: f32[4,8,32], index: 2, kind: input, shape index: {}]   ;;  %s1840_s3 = inlined_call_operand.vmem [shape: f32[1,32], index: 3, kind: input, shape index: {}]   ;;  %s1841_s4 = inlined_call_operand.vmem [shape: f32[64,64], index: 4, kind: input, shape index: {}]   ;;  %s1842_s5 = inlined_call_operand.hbm [shape: f32[16,32], index: 5, kind: output, shape index: {}]  }
   0x1   :  { %v37_v0 = vld [vmem:[%s1837_s0 + $0x20] sm:$0x1]  ;;  %v36_v1 = vld [vmem:[%s1837_s0 + $0x18] sm:$0xff]  ;;  %v35_v3 = vld [vmem:[%s1837_s0 + $0x10] sm:$0xff] }
   0x2   :  { %1445 = vmatprep.subr.msk.mxu0 %vm75_vm0, %v37_v0  ;;  %v21_v2 = vld [vmem:[%s1838_s1] sm:$0xff]  ;;  %v34_v4 = vld [vmem:[%s1837_s0 + $0x8] sm:$0xff] }
   0x3   :  { %1446 = vmatpush3.msk.msra.mxu0 %vm75_vm0, %v37_v0  ;;  %1455 = vmatprep.mubr.msk.f32.mxu0 %vm38_vm1, %v21_v2 }
   0x4   :  { %1447 = vmatprep.subr.mxu0 %v36_v1 }
   0x5   :  { %1448 = vmatpush3.msra.mxu0 %v36_v1 }
   0x6   :  { %10 = vsyncpa [#allocation3], 0  ;;  %1449 = vmatprep.subr.mxu0 %v35_v3  ;;  %v33_v5 = vld [vmem:[%s1837_s0] sm:$0xff]  ;;  %v22_v6 = vld [vmem:[%s1838_s1 + $0x8] sm:$0xff]  ;;  %vm596_vm2 = vcmask 64512   ;;  %vm750_vm3 = vcmask 523264  }
   0x7   :  { %1450 = vmatpush3.msra.mxu0 %v35_v3  ;;  %v23_v7 = vld [vmem:[%s1838_s1 + $0x10] sm:$0xff]  ;;  %v24_v8 = vld [vmem:[%s1838_s1 + $0x18] sm:$0xff]  ;;  %v25_v9 = vld [vmem:[%s1838_s1 + $0x20] sm:$0xff]  ;;  %vm1296_vm4 = vcmask 261120   ;;  %s1607_s23 = smov [#allocation2]  }
   0x8   :  { %1451 = vmatprep.subr.mxu0 %v34_v4  ;;  %v26_v10 = vld [vmem:[%s1838_s1 + $0x28] sm:$0xff]  ;;  %v27_v11 = vld [vmem:[%s1838_s1 + $0x30] sm:$0xff]  ;;  %v28_v12 = vld [vmem:[%s1838_s1 + $0x38] sm:$0xff]  ;;  %s1327_s24 = sshll.u32 %s1607_s23, 4  ;;  %s1328_s24 = int_to_ptr.vmem [resolvable:$true] %s1327_s24 }
   0x9   :  { %1452 = vmatpush3.msra.mxu0 %v34_v4  ;;  %v29_v13 = vld [vmem:[%s1838_s1 + $0x40] sm:$0xff]  ;;  %v30_v14 = vld [vmem:[%s1838_s1 + $0x48] sm:$0xff]  ;;  %v31_v15 = vld [vmem:[%s1838_s1 + $0x50] sm:$0xff]  ;;  %s1585_s25 = scalar_lea.vmem %s1328_s24, 256  ;;  %p1590_p1 = scmp.lt.s32.totalorder %s1328_s24, %s1328_s24 }
   0xa   :  { %1453 = vmatprep.subr.mxu0 %v33_v5  ;;  %v32_v16 = vld [vmem:[%s1838_s1 + $0x58] sm:$0xff]  ;;  %v589_v46 = vld [vmem:[%s1841_s4 + $0x8] sm:$0xff]  ;;  %v588_v48 = vld [vmem:[%s1841_s4] sm:$0xff]  ;;  %p1586_p0 = scmp.ne.s32.totalorder %s1328_s24, %s1585_s25  ;;  %p1591_p2 = scmp.lt.s32.totalorder %s1585_s25, %s1585_s25 }
   0xb   :  { %1454 = vmatpush3.msra.mxu0 %v33_v5  ;;  %v590_v54 = vld [vmem:[%s1841_s4 + $0x10] sm:$0xff]  ;;  %v591_v56 = vld [vmem:[%s1841_s4 + $0x18] sm:$0xff]  ;;  %v593_v59 = vld [vmem:[%s1841_s4 + $0x28] sm:$0xff] }
   0xc   :  { %1456 = vmatmul.mubr.msk.f32.vlgmr.msra.gmra.mxu0 %vm38_vm1, %v22_v6  ;;  %v592_v61 = vld [vmem:[%s1841_s4 + $0x20] sm:$0xff]  ;;  %v595_v3 = vld [vmem:[%s1841_s4 + $0x38] sm:$0xff]  ;;  %v594_v5 = vld [vmem:[%s1841_s4 + $0x30] sm:$0xff]  ;;  %p1592_p3 = por %p1591_p2, %p1590_p1 }
   0xd   :  { %1458 = vmatprep.mubr.msk.f32.mxu0 %vm38_vm1, %v23_v7 }
   0xe   :  { %p1593_p4 = pnand %p1592_p3, %p1586_p0 }
  0x10   :  { %1459 = vmatmul.mubr.msk.f32.gmra.mxu0 %vm38_vm1, %v24_v8 }
  0x11   :  { %1461 = vmatprep.mubr.msk.f32.mxu0 %vm38_vm1, %v25_v9 }
  0x14   :  { %1462 = vmatmul.mubr.msk.f32.gmra.mxu0 %vm38_vm1, %v26_v10 }
  0x15   :  { %1464 = vmatprep.mubr.msk.f32.mxu0 %vm38_vm1, %v27_v11 }
  0x18   :  { %1465 = vmatmul.mubr.msk.f32.gmra.mxu0 %vm38_vm1, %v28_v12 }
  0x19   :  { %1467 = vmatprep.mubr.msk.f32.mxu0 %vm38_vm1, %v29_v13 }
  0x1c   :  { %1468 = vmatmul.mubr.msk.f32.gmra.mxu0 %vm38_vm1, %v30_v14 }
  0x1d   :  { %1470 = vmatprep.mubr.msk.f32.mxu0 %vm38_vm1, %v31_v15 }
  0x20   :  { %1471 = vmatmul.mubr.msk.f32.gmra.mxu0 %vm38_vm1, %v32_v16 }
  0xcc   :  { %v1457_v17 = vpop.f32.mrf.mxu0 }
  0xce   :  { %v145_v18 = vpop.f32.mrf.mxu0 }
  0xd0   :  { %v1460_v19 = vpop.f32.mrf.mxu0 }
  0xd2   :  { %v155_v20 = vpop.f32.mrf.mxu0 }
  0xd4   :  { %v1463_v21 = vpop.f32.mrf.mxu0 }
  0xd5   :  { %364 = vxpose.xlu1.b32.start.end [1/1] (short) (narrow) %v1463_v21, 16 }
  0xd6   :  { %v165_v22 = vpop.f32.mrf.mxu0 }
  0xd8   :  { %v1466_v23 = vpop.f32.mrf.mxu0 }
  0xd9   :  { %428 = vxpose.xlu0.b32.start.end [1/1] (short) (narrow) %v1466_v23, 16 }
  0xda   :  { %332 = vxpose.xlu1.b32.start.end [1/1] (short) (narrow) %v165_v22, 16  ;;  %v175_v24 = vpop.f32.mrf.mxu0 }
  0xdc   :  { %v1703_v25 = vpop.f32.mrf.mxu0 }
  0xde   :  { %396 = vxpose.xlu0.b32.start.end [1/1] (short) (narrow) %v175_v24, 16  ;;  %v1705_v26 = vpop.f32.mrf.mxu0 }
  0xdf   :  { %236 = vxpose.xlu1.b32.start.end [1/1] (short) (narrow) %v1457_v17, 16 }
  0xe0   :  { %v1472_v27 = vpop.f32.mrf.mxu0 }
  0xe3   :  { %204 = vxpose.xlu0.b32.start.end [1/1] (short) (narrow) %v145_v18, 16 }
  0xe4   :  { %300 = vxpose.xlu1.b32.start.end [1/1] (short) (narrow) %v1460_v19, 16 }
  0xe8   :  { %268 = vxpose.xlu0.b32.start.end [1/1] (short) (narrow) %v155_v20, 16 }
  0xed   :  { %556 = vxpose.xlu0.b32.start.end [1/1] (short) (narrow) %v1472_v27, 16 }
 0x151   :  { %v380_v30 = vpop.trf.xlu1 }
 0x155   :  { %v444_v28 = vpop.trf.xlu0  ;;  %v381_v33 = vpop.trf.xlu1 }
 0x159   :  { %v445_v29 = vpop.trf.xlu0  ;;  %v348_v35 = vpop.trf.xlu1 }
 0x15a   :  { %1473 = vmatprep.subr.msk.mxu1 %vm596_vm2, %v445_v29 }
 0x15b   :  { %1474 = vmatpush3.xpose.msk.msra.mxu1 %vm596_vm2, %v445_v29 }
 0x15c   :  { %1475 = vmatprep.subr.msk.mxu1 %vm596_vm2, %v444_v28 }
 0x15d   :  { %v412_v31 = vpop.trf.xlu0  ;;  %v349_v36 = vpop.trf.xlu1 }
 0x15f   :  { %1476 = vmatpush3.xpose.msk.msra.mxu1 %vm596_vm2, %v444_v28 }
 0x161   :  { %v413_v32 = vpop.trf.xlu0  ;;  %v252_v37 = vpop.trf.xlu1 }
 0x162   :  { %1477 = vmatprep.subr.msk.mxu1 %vm596_vm2, %v413_v32 }
 0x163   :  { %1478 = vmatpush3.xpose.msk.msra.mxu1 %vm596_vm2, %v413_v32 }
 0x164   :  { %1479 = vmatprep.subr.msk.mxu1 %vm596_vm2, %v412_v31 }
 0x165   :  { %v220_v34 = vpop.trf.xlu0  ;;  %v253_v39 = vpop.trf.xlu1 }
 0x166   :  { %1489 = vmatprep.mubr.msk.f32.mxu1 %vm596_vm2, %v220_v34 }
 0x167   :  { %1480 = vmatpush3.xpose.msk.msra.mxu1 %vm596_vm2, %v412_v31 }
 0x168   :  { %1481 = vmatprep.subr.msk.mxu1 %vm596_vm2, %v381_v33 }
 0x169   :  { %v221_v38 = vpop.trf.xlu0  ;;  %v316_v41 = vpop.trf.xlu1 }
 0x16b   :  { %1482 = vmatpush3.xpose.msk.msra.mxu1 %vm596_vm2, %v381_v33 }
 0x16c   :  { %1483 = vmatprep.subr.msk.mxu1 %vm596_vm2, %v380_v30 }
 0x16d   :  { %v284_v40 = vpop.trf.xlu0  ;;  %v317_v43 = vpop.trf.xlu1 }
 0x16f   :  { %1484 = vmatpush3.xpose.msk.msra.mxu1 %vm596_vm2, %v380_v30 }
 0x170   :  { %1485 = vmatprep.subr.msk.mxu1 %vm596_vm2, %v349_v36 }
 0x171   :  { %v285_v42 = vpop.trf.xlu0 }
 0x173   :  { %1486 = vmatpush3.xpose.msk.msra.mxu1 %vm596_vm2, %v349_v36 }
 0x174   :  { %1487 = vmatprep.subr.msk.mxu1 %vm596_vm2, %v348_v35 }
 0x175   :  { %v572_v44 = vpop.trf.xlu0 }
 0x177   :  { %1488 = vmatpush3.xpose.msk.msra.mxu1 %vm596_vm2, %v348_v35 }
 0x179   :  { %v573_v45 = vpop.trf.xlu0 }
 0x17a   :  { %1490 = vmatmul.mubr.msk.f32.vlgmr.msra.gmra.mxu1 %vm596_vm2, %v221_v38  ;;  %1501 = vmatprep.subr.mxu0 %v573_v45 }
 0x17b   :  { %1492 = vmatprep.mubr.msk.f32.mxu1 %vm596_vm2, %v252_v37  ;;  %1502 = vmatpush3.msra.mxu0 %v573_v45 }
 0x17c   :  { %1503 = vmatprep.subr.mxu0 %v572_v44 }
 0x17d   :  { %1504 = vmatpush3.msra.mxu0 %v572_v44 }
 0x17e   :  { %1493 = vmatmul.mubr.msk.f32.gmra.mxu1 %vm596_vm2, %v253_v39 }
 0x17f   :  { %1495 = vmatprep.mubr.msk.f32.mxu1 %vm596_vm2, %v284_v40 }
 0x182   :  { %1496 = vmatmul.mubr.msk.f32.gmra.mxu1 %vm596_vm2, %v285_v42 }
 0x183   :  { %1498 = vmatprep.mubr.msk.f32.mxu1 %vm596_vm2, %v316_v41 }
 0x186   :  { %1499 = vmatmul.mubr.msk.f32.gmra.mxu1 %vm596_vm2, %v317_v43 }
 0x23a   :  { %v1491_v47 = vpop.f32.mrf.mxu1 }
 0x23b   :  { %v717_v49 = vadd.f32 %v1491_v47, %v589_v46 }
 0x23c   :  { %v711_v50 = vpop.f32.mrf.mxu1 }
 0x23d   :  { %v712_v51 = vadd.f32 %v711_v50, %v588_v48  ;;  %v754_v52 = vsel %vm750_vm3, %v717_v49, -inf }
 0x23e   :  { %755 = vmax.xlane.f32.xlu1 %v754_v52  ;;  %v1494_v53 = vpop.f32.mrf.mxu1 }
 0x23f   :  { %v751_v55 = vsel %vm750_vm3, %v712_v51, -inf  ;;  %v727_v62 = vadd.f32 %v1494_v53, %v591_v56 }
 0x240   :  { %v721_v57 = vpop.f32.mrf.mxu1  ;;  %752 = vmax.xlane.f32.xlu0 %v751_v55  ;;  %v195_v55 = vpop.f32.mrf.mxu0 }
 0x241   :  { %v722_v58 = vadd.f32 %v721_v57, %v590_v54  ;;  %v760_v6 = vsel %vm750_vm3, %v727_v62, -inf }
 0x242   :  { %v1497_v60 = vpop.f32.mrf.mxu1 }
 0x243   :  { %v757_v63 = vsel %vm750_vm3, %v722_v58, -inf  ;;  %v737_v1 = vadd.f32 %v1497_v60, %v593_v59 }
 0x244   :  { %758 = vmax.xlane.f32.xlu1 %v757_v63  ;;  %v731_v0 = vpop.f32.mrf.mxu1 }
 0x245   :  { %v732_v2 = vadd.f32 %v731_v0, %v592_v61  ;;  %v766_v11 = vsel %vm750_vm3, %v737_v1, -inf }
 0x246   :  { %v1500_v4 = vpop.f32.mrf.mxu1 }
 0x247   :  { %v763_v7 = vsel %vm750_vm3, %v732_v2, -inf  ;;  %v747_v9 = vadd.f32 %v1500_v4, %v595_v3 }
 0x248   :  { %761 = vmax.xlane.f32.xlu1 %v760_v6  ;;  %v741_v8 = vpop.f32.mrf.mxu1  ;;  %764 = vmax.xlane.f32.xlu0 %v763_v7 }
 0x249   :  { %v742_v10 = vadd.f32 %v741_v8, %v594_v5  ;;  %v772_v13 = vsel %vm750_vm3, %v747_v9, -inf }
 0x24b   :  { %v769_v12 = vsel %vm750_vm3, %v742_v10, -inf }
 0x24c   :  { %767 = vmax.xlane.f32.xlu1 %v766_v11  ;;  %770 = vmax.xlane.f32.xlu0 %v769_v12 }
 0x250   :  { %773 = vmax.xlane.f32.xlu1 %v772_v13 }
 0x279   :  { %492 = vxpose.xlu0.b32.start.end [1/1] (short) (narrow) %v1703_v25, 16 }
 0x2c7   :  { %v756_v14 = vpop.xlane.xlu1 %755 }
 0x2c8   :  { %v776_v15 = vsub.f32 %v717_v49, %v756_v14 }
 0x2c9   :  { %v753_v16 = vpop.xlane.xlu0 %752 }
 0x2ca   :  { %v785_v17 = vmul.f32 1.442695, %v776_v15  ;;  %v775_v18 = vsub.f32 %v712_v51, %v753_v16 }
 0x2cc   :  { %1553 = vpow2.f32 %v785_v17  ;;  %v783_v19 = vmul.f32 1.442695, %v775_v18 }
 0x2cd   :  { %v759_v20 = vpop.xlane.xlu1 %758 }
 0x2ce   :  { %1555 = vpow2.f32 %v783_v19  ;;  %v777_v21 = vsub.f32 %v722_v58, %v759_v20 }
 0x2d0   :  { %v787_v22 = vmul.f32 1.442695, %v777_v21  ;;  %v968_v21 = vld [vmem:[%s1839_s2] sm:$0xff] }
 0x2d1   :  { %v762_v23 = vpop.xlane.xlu1 %761  ;;  %v765_v24 = vpop.xlane.xlu0 %764  ;;  %1529 = vmatprep.subr.mxu1 %v968_v21 }
 0x2d2   :  { %1557 = vpow2.f32 %v787_v22  ;;  %v778_v27 = vsub.f32 %v727_v62, %v762_v23  ;;  %v779_v28 = vsub.f32 %v732_v2, %v765_v24  ;;  %1530 = vmatpush3.msra.mxu1 %v968_v21  ;;  %v969_v22 = vld [vmem:[%s1839_s2 + $0x8] sm:$0xff]  ;;  %v970_v23 = vld [vmem:[%s1839_s2 + $0x10] sm:$0xff]  ;;  %v971_v24 = vld [vmem:[%s1839_s2 + $0x18] sm:$0xff] }
 0x2d3   :  { %1539 = vmatprep.subr.mxu1 %v970_v23 }
 0x2d4   :  { %v789_v29 = vmul.f32 1.442695, %v778_v27  ;;  %v791_v30 = vmul.f32 1.442695, %v779_v28 }
 0x2d5   :  { %v768_v31 = vpop.xlane.xlu1 %767  ;;  %v771_v25 = vpop.xlane.xlu0 %770 }
 0x2d6   :  { %1559 = vpow2.f32 %v789_v29  ;;  %v780_v32 = vsub.f32 %v737_v1, %v768_v31  ;;  %v781_v33 = vsub.f32 %v742_v10, %v771_v25 }
 0x2d7   :  { %1561 = vpow2.f32 %v791_v30 }
 0x2d8   :  { %v793_v34 = vmul.f32 1.442695, %v780_v32  ;;  %v795_v35 = vmul.f32 1.442695, %v781_v33 }
 0x2d9   :  { %v1764_v36 = vpop.eup %1553  ;;  %v774_v37 = vpop.xlane.xlu1 %773 }
 0x2da   :  { %1563 = vpow2.f32 %v793_v34  ;;  %v782_v38 = vsub.f32 %v747_v9, %v774_v37  ;;  %v802_v39 = vsel %vm750_vm3, %v1764_v36, 0.0 }
 0x2db   :  { %v1556_v40 = vpop.eup %1555  ;;  %1565 = vpow2.f32 %v795_v35  ;;  %803 = vadd.xlane.f32.xlu1 %v802_v39 }
 0x2dc   :  { %v797_v41 = vmul.f32 1.442695, %v782_v38  ;;  %v799_v42 = vsel %vm750_vm3, %v1556_v40, 0.0 }
 0x2dd   :  { %800 = vadd.xlane.f32.xlu0 %v799_v42 }
 0x2de   :  { %1567 = vpow2.f32 %v797_v41 }
 0x2df   :  { %v1558_v43 = vpop.eup %1557 }
 0x2e0   :  { %v805_v44 = vsel %vm750_vm3, %v1558_v43, 0.0 }
 0x2e1   :  { %806 = vadd.xlane.f32.xlu0 %v805_v44 }
 0x2e3   :  { %v1770_v45 = vpop.eup %1559 }
 0x2e4   :  { %v1772_v46 = vpop.eup %1561  ;;  %v808_v47 = vsel %vm750_vm3, %v1770_v45, 0.0 }
 0x2e5   :  { %809 = vadd.xlane.f32.xlu1 %v808_v47  ;;  %v811_v48 = vsel %vm750_vm3, %v1772_v46, 0.0 }
 0x2e6   :  { %812 = vadd.xlane.f32.xlu0 %v811_v48 }
 0x2e7   :  { %v1778_v49 = vpop.eup %1563 }
 0x2e8   :  { %v1780_v50 = vpop.eup %1565  ;;  %v814_v51 = vsel %vm750_vm3, %v1778_v49, 0.0 }
 0x2e9   :  { %815 = vadd.xlane.f32.xlu1 %v814_v51  ;;  %v817_v52 = vsel %vm750_vm3, %v1780_v50, 0.0  ;;  %v1383_v51 = vld [vmem:[%s1840_s3] ss:$0 sm:$0xff] }
 0x2ea   :  { %818 = vadd.xlane.f32.xlu0 %v817_v52 }
 0x2eb   :  { %v1568_v53 = vpop.eup %1567 }
 0x2ec   :  { %v820_v54 = vsel %vm750_vm3, %v1568_v53, 0.0 }
 0x2ed   :  { %821 = vadd.xlane.f32.xlu1 %v820_v54 }
 0x2f5   :  { %v508_v56 = vpop.trf.xlu0 }
 0x2f9   :  { %v509_v57 = vpop.trf.xlu0 }
 0x317   :  { %460 = vxpose.xlu0.b32.start.end [1/1] (short) (narrow) %v1705_v26, 16 }
 0x320   :  { %524 = vxpose.xlu1.b32.start.end [1/1] (short) (narrow) %v195_v55, 16 }
 0x364   :  { %v804_v61 = vpop.xlane.xlu1 %803 }
 0x366   :  { %v801_v58 = vpop.xlane.xlu0 %800 }
 0x367   :  { %1569 = vrcp.f32 %v801_v58 }
 0x368   :  { %1571 = vrcp.f32 %v804_v61 }
 0x36a   :  { %v807_v63 = vpop.xlane.xlu0 %806 }
 0x36b   :  { %1573 = vrcp.f32 %v807_v63 }
 0x36e   :  { %v810_v62 = vpop.xlane.xlu1 %809 }
 0x36f   :  { %v813_v1 = vpop.xlane.xlu0 %812  ;;  %1575 = vrcp.f32 %v810_v62 }
 0x370   :  { %1577 = vrcp.f32 %v813_v1 }
 0x372   :  { %v816_v0 = vpop.xlane.xlu1 %815 }
 0x373   :  { %v819_v3 = vpop.xlane.xlu0 %818  ;;  %1579 = vrcp.f32 %v816_v0 }
 0x374   :  { %v1570_v59 = vpop.eup %1569  ;;  %1581 = vrcp.f32 %v819_v3 }
 0x375   :  { %v831_v60 = vmul.f32 %v1570_v59, %v1556_v40  ;;  %v1572_v7 = vpop.eup %1571 }
 0x376   :  { %v822_v2 = vpop.xlane.xlu1 %821  ;;  %v832_v9 = vmul.f32 %v1572_v7, %v1764_v36 }
 0x377   :  { %1517 = vmatprep.mubr.msk.f32.mxu0 %vm750_vm3, %v831_v60  ;;  %1583 = vrcp.f32 %v822_v2 }
 0x378   :  { %v1574_v8 = vpop.eup %1573 }
 0x379   :  { %v833_v11 = vmul.f32 %v1574_v8, %v1558_v43 }
 0x37c   :  { %v1576_v10 = vpop.eup %1575 }
 0x37d   :  { %v1578_v12 = vpop.eup %1577  ;;  %v834_v13 = vmul.f32 %v1576_v10, %v1770_v45 }
 0x37e   :  { %v835_v15 = vmul.f32 %v1578_v12, %v1772_v46 }
 0x380   :  { %v1580_v14 = vpop.eup %1579 }
 0x381   :  { %v1582_v16 = vpop.eup %1581  ;;  %v836_v17 = vmul.f32 %v1580_v14, %v1778_v49 }
 0x382   :  { %v837_v19 = vmul.f32 %v1582_v16, %v1780_v50 }
 0x384   :  { %v1584_v18 = vpop.eup %1583 }
 0x385   :  { %v838_v20 = vmul.f32 %v1584_v18, %v1568_v53 }
 0x393   :  { %v476_v5 = vpop.trf.xlu0 }
 0x397   :  { %v477_v6 = vpop.trf.xlu0 }
 0x39c   :  { %v540_v26 = vpop.trf.xlu1 }
 0x3a0   :  { %v541_v4 = vpop.trf.xlu1 }
 0x3a1   :  { %1505 = vmatprep.subr.mxu0 %v541_v4 }
 0x3a2   :  { %1506 = vmatpush3.msra.mxu0 %v541_v4 }
 0x3a3   :  { %1507 = vmatprep.subr.mxu0 %v540_v26 }
 0x3a4   :  { %1508 = vmatpush3.msra.mxu0 %v540_v26 }
 0x3a5   :  { %1509 = vmatprep.subr.mxu0 %v509_v57 }
 0x3a6   :  { %1510 = vmatpush3.msra.mxu0 %v509_v57 }
 0x3a7   :  { %1511 = vmatprep.subr.mxu0 %v508_v56 }
 0x3a8   :  { %1512 = vmatpush3.msra.mxu0 %v508_v56 }
 0x3a9   :  { %1513 = vmatprep.subr.mxu0 %v477_v6 }
 0x3aa   :  { %1514 = vmatpush3.msra.mxu0 %v477_v6 }
 0x3ab   :  { %1515 = vmatprep.subr.mxu0 %v476_v5 }
 0x3ac   :  { %1516 = vmatpush3.msra.mxu0 %v476_v5 }
 0x3ad   :  { %1518 = vmatmul.mubr.msk.f32.vlgmr.msra.gmra.mxu0 %vm750_vm3, %v832_v9  ;;  %1534 = vmatprep.subr.mxu0 %v969_v22 }
 0x3ae   :  { %1520 = vmatprep.mubr.msk.f32.mxu0 %vm750_vm3, %v833_v11  ;;  %1535 = vmatpush3.msra.mxu0 %v969_v22 }
 0x3af   :  { %1544 = vmatprep.subr.mxu0 %v971_v24 }
 0x3b1   :  { %1521 = vmatmul.mubr.msk.f32.gmra.mxu0 %vm750_vm3, %v834_v13 }
 0x3b2   :  { %1523 = vmatprep.mubr.msk.f32.mxu0 %vm750_vm3, %v835_v15 }
 0x3b5   :  { %1524 = vmatmul.mubr.msk.f32.gmra.mxu0 %vm750_vm3, %v836_v17 }
 0x3b6   :  { %1526 = vmatprep.mubr.msk.f32.mxu0 %vm750_vm3, %v837_v19 }
 0x3b9   :  { %1527 = vmatmul.mubr.msk.f32.gmra.mxu0 %vm750_vm3, %v838_v20 }
 0x46d   :  { %v1519_v27 = vpop.f32.mrf.mxu0 }
 0x46f   :  { %v929_v28 = vpop.f32.mrf.mxu0 }
 0x470   :  { %1531 = vmatprep.mubr.msk.f32.mxu1 %vm596_vm2, %v929_v28 }
 0x471   :  { %v1522_v29 = vpop.f32.mrf.mxu0  ;;  %1532 = vmatmul.mubr.msk.f32.vlgmr.msra.gmra.mxu1 %vm596_vm2, %v1519_v27 }
 0x472   :  { %1540 = vmatpush3.msra.mxu1 %v970_v23 }
 0x473   :  { %v939_v30 = vpop.f32.mrf.mxu0 }
 0x474   :  { %1536 = vmatprep.mubr.msk.f32.mxu0 %vm596_vm2, %v939_v30 }
 0x475   :  { %v1525_v31 = vpop.f32.mrf.mxu0  ;;  %1537 = vmatmul.mubr.msk.f32.vlgmr.msra.gmra.mxu0 %vm596_vm2, %v1522_v29 }
 0x476   :  { %1545 = vmatpush3.msra.mxu0 %v971_v24 }
 0x477   :  { %v949_v25 = vpop.f32.mrf.mxu0 }
 0x478   :  { %1541 = vmatprep.mubr.msk.f32.mxu1 %vm596_vm2, %v949_v25 }
 0x479   :  { %v1528_v32 = vpop.f32.mrf.mxu0  ;;  %1542 = vmatmul.mubr.msk.f32.vlgmr.msra.gmra.mxu1 %vm596_vm2, %v1525_v31 }
 0x47b   :  { %v959_v33 = vpop.f32.mrf.mxu0 }
 0x47c   :  { %1546 = vmatprep.mubr.msk.f32.mxu0 %vm596_vm2, %v959_v33 }
 0x47d   :  { %1547 = vmatmul.mubr.msk.f32.vlgmr.msra.gmra.mxu0 %vm596_vm2, %v1528_v32 }
 0x531   :  { %v1533_v34 = vpop.f32.mrf.mxu1 }
 0x532   :  { %v1304_v40 = vsel %vm1296_vm4, %v1533_v34, 0.0 }
 0x533   :  { %v1044_v36 = vpop.f32.mrf.mxu1 }
 0x534   :  { %v1297_v45 = vsel %vm1296_vm4, %v1044_v36, 0.0 }
 0x535   :  { %v1538_v35 = vpop.f32.mrf.mxu0 }
 0x536   :  { %v1305_v38 = vsel %vm1296_vm4, %v1538_v35, 0.0 }
 0x537   :  { %v1125_v37 = vpop.f32.mrf.mxu0  ;;  %v1306_v43 = vadd.f32 %v1305_v38, %v1304_v40 }
 0x538   :  { %v1298_v41 = vsel %vm1296_vm4, %v1125_v37, 0.0 }
 0x539   :  { %v1543_v39 = vpop.f32.mrf.mxu1  ;;  %v1299_v47 = vadd.f32 %v1298_v41, %v1297_v45 }
 0x53a   :  { %v1307_v42 = vsel %vm1296_vm4, %v1543_v39, 0.0 }
 0x53b   :  { %v1206_v44 = vpop.f32.mrf.mxu1  ;;  %v1308_v48 = vadd.f32 %v1307_v42, %v1306_v43 }
 0x53c   :  { %v1300_v46 = vsel %vm1296_vm4, %v1206_v44, 0.0 }
 0x53d   :  { %v1548_v49 = vpop.f32.mrf.mxu0  ;;  %v1301_v52 = vadd.f32 %v1300_v46, %v1299_v47 }
 0x53e   :  { %v1309_v50 = vsel %vm1296_vm4, %v1548_v49, 0.0 }
 0x53f   :  { %v1310_v53 = vadd.f32 %v1309_v50, %v1308_v48  ;;  %v1287_v54 = vpop.f32.mrf.mxu0 }
 0x540   :  { %v1302_v55 = vsel %vm1296_vm4, %v1287_v54, 0.0 }
 0x541   :  { %v1319_v56 = vadd.f32 %v1383_v51, %v1310_v53  ;;  %v1303_v57 = vadd.f32 %v1302_v55, %v1301_v52 }
 0x543   :  { %1321 = vst.msk [vmem:[#allocation2 + $0x8] sm:$0xff] %vm1296_vm4, %v1319_v56  ;;  %v1318_v58 = vadd.f32 %v1383_v51, %v1303_v57 }
 0x545   :  { %1320 = vst.msk [vmem:[#allocation2] sm:$0xff] %vm1296_vm4, %v1318_v58 }
 0x546   :  { %1596 = shalt.err (!%p1593_p4)
}
 0x547   :  { %s1608_s3 = smov 128   ;;  %s1609_s1 = smov 8  }
 0x548   :  { %1333 = dma.vmem_to_hbm [thread:$0]  %s1328_s24, 256, %s1842_s5, [#allocation3], %s1608_s3, %s1608_s3, %s1609_s1  }
 0x549   :  { %1605 = dma.done.wait [#allocation3], 256  }
 0x54a   :  { %1606 = vsyncadd [#allocation3], 4294967040 }
 0x54b   :  { %1337 = vsyncpa [#allocation3], 1 }

</bundles_post_ra>
